<compile_context>
chip_gen: v6e
topology: v6e:2x2x1
jax: 0.10.0
libtpu: 0.0.40
codegen_flags: <defaults>
</compile_context>

<pallas_src>
import math

import jax
import jax.numpy as jnp
from jax.experimental import pallas as pl
from jax.experimental.pallas import tpu as pltpu


# nn.Linear convention: y = x @ W.T with W: (out_features, in_features).
# Contract the last dim of both operands: (M, K) x (O, K) -> (M, O).
_CONTRACT_LAST = (((1,), (1,)), ((), ()))


def _make_attention_pool_kernel(gated: bool):
    def kernel(x_ref, vw_ref, vw2_ref, *rest):
        if gated:
            uw_ref, uw2_ref, pooled_ref, a_ref = rest
        else:
            pooled_ref, a_ref = rest

        x3 = x_ref[...]                               # (B, N, F) f32
        B, N, F = x3.shape
        xf = x3.reshape(B * N, F)                     # sublane merge; lane dim (F) unchanged

        # attention_V: Linear(F -> H, no bias) -> tanh -> Linear(H -> 1, no bias)
        h = jax.lax.dot_general(
            xf, vw_ref[...], _CONTRACT_LAST, preferred_element_type=jnp.float32
        )                                             # (B*N, H)
        h = jnp.tanh(h)
        h3 = h.reshape(B, N, -1)                      # (B, N, H); lane dim (H) unchanged
        # Final H -> 1 projection as broadcast-multiply + lane reduce
        # (avoids a degenerate N=1 MXU matmul and any lane<->sublane relayout).
        vvec = vw2_ref[...].reshape(1, 1, -1)         # (1, 1, H)
        a3 = jnp.sum(h3 * vvec, axis=-1, keepdims=True)   # (B, N, 1)

        if gated:
            hu = jax.lax.dot_general(
                xf, uw_ref[...], _CONTRACT_LAST, preferred_element_type=jnp.float32
            )                                         # (B*N, H)
            hu = 1.0 / (1.0 + jnp.exp(-hu))           # sigmoid
            hu3 = hu.reshape(B, N, -1)                # (B, N, H)
            uvec = uw2_ref[...].reshape(1, 1, -1)     # (1, 1, H)
            au3 = jnp.sum(hu3 * uvec, axis=-1, keepdims=True)  # (B, N, 1)
            a3 = a3 * au3

        # A (pre-softmax logits), exactly as returned by the PyTorch module.
        a_ref[...] = a3.astype(a_ref.dtype)

        # softmax over the instance axis (axis=1, sublane axis here).
        m = jnp.max(a3, axis=1, keepdims=True)        # (B, 1, 1)
        p = jnp.exp(a3 - m)                           # (B, N, 1)
        s = jnp.sum(p, axis=1, keepdims=True)         # (B, 1, 1)
        w = p * pl.reciprocal(s, approx=True)         # (B, N, 1)  (EUP recip)

        # Weighted pooling over instances -> dense (B, F) store.
        pooled = jnp.sum(x3.astype(jnp.float32) * w, axis=1)  # (B, F)
        pooled_ref[...] = pooled.astype(pooled_ref.dtype)

    return kernel


def attention_pool_forward(x, V_w, V_w2, U_w=None, U_w2=None, *, gated=False):
    """AttentionPool.forward in a single fused Pallas kernel.

    x    : (B, N, F)
    V_w  : (H, F)   -- attention_V[0].weight  (nn.Linear(F, H, bias=False))
    V_w2 : (1, H)   -- attention_V[3].weight  (nn.Linear(H, 1, bias=False))
    U_w, U_w2 : same shapes, only used when gated=True.
    Returns (pooled (B, F), A (B, N, 1)).
    """
    B, N, F = x.shape
    args = (x, V_w, V_w2) + ((U_w, U_w2) if gated else ())
    vmem = lambda: pl.BlockSpec(memory_space=pltpu.MemorySpace.VMEM)
    return pl.pallas_call(
        _make_attention_pool_kernel(gated),
        out_shape=(
            jax.ShapeDtypeStruct((B, F), x.dtype),
            jax.ShapeDtypeStruct((B, N, 1), x.dtype),
        ),
        in_specs=[vmem() for _ in args],
        out_specs=(vmem(), vmem()),
    )(*args)


# ----------------------------------------------------------------------------
# Plain-JAX reference (mirrors the PyTorch module exactly)
# ----------------------------------------------------------------------------
def attention_pool_ref(x, V_w, V_w2, U_w=None, U_w2=None, *, gated=False):
    B, N, F = x.shape
    xf = x.reshape(B * N, F)
    A = jnp.tanh(xf @ V_w.T) @ V_w2.T
    if gated:
        A = A * (jax.nn.sigmoid(xf @ U_w.T) @ U_w2.T)
    A = A.reshape(B, N, 1)
    w = jax.nn.softmax(A, axis=1)
    pooled = (x * w).sum(axis=1)
    return pooled, A


# ----------------------------------------------------------------------------
if __name__ == "__main__":
    # AttentionPool(in_features=32, hidden_dim=16): B=2 bags, N=8 instances.
    B, N, F, H = 2, 8, 32, 16

    key = jax.random.PRNGKey(0)
    kx, kv, kv2, ku, ku2 = jax.random.split(key, 5)

    x = jax.random.normal(kx, (B, N, F), dtype=jnp.float32)
    # nn.Linear weights, (out_features, in_features)
    V_w = jax.random.normal(kv, (H, F), dtype=jnp.float32) * (1.0 / math.sqrt(F))
    V_w2 = jax.random.normal(kv2, (1, H), dtype=jnp.float32) * (1.0 / math.sqrt(H))
    U_w = jax.random.normal(ku, (H, F), dtype=jnp.float32) * (1.0 / math.sqrt(F))
    U_w2 = jax.random.normal(ku2, (1, H), dtype=jnp.float32) * (1.0 / math.sqrt(H))

    # --- default (non-gated) path ---
    pooled, A = attention_pool_forward(x, V_w, V_w2, gated=False)
    pooled = jax.block_until_ready(pooled)
    A = jax.block_until_ready(A)

    pooled_ref, A_ref = attention_pool_ref(x, V_w, V_w2, gated=False)
    assert pooled.shape == (B, F) and A.shape == (B, N, 1)
    assert jnp.allclose(A, A_ref, atol=1e-4, rtol=1e-4), "A mismatch (non-gated)"
    assert jnp.allclose(pooled, pooled_ref, atol=5e-3, rtol=5e-3), "pooled mismatch (non-gated)"

    # --- gated path ---
    pooled_g, A_g = attention_pool_forward(x, V_w, V_w2, U_w, U_w2, gated=True)
    pooled_g = jax.block_until_ready(pooled_g)
    A_g = jax.block_until_ready(A_g)

    pooled_gr, A_gr = attention_pool_ref(x, V_w, V_w2, U_w, U_w2, gated=True)
    assert jnp.allclose(A_g, A_gr, atol=1e-4, rtol=1e-4), "A mismatch (gated)"
    assert jnp.allclose(pooled_g, pooled_gr, atol=5e-3, rtol=5e-3), "pooled mismatch (gated)"

    print("KERNEL_OK")
</pallas_src>

<mosaic_0001>
module attributes {stable_mosaic.version = 11 : i64} {
  func.func @kernel(%arg0: memref<2x8x32xf32, #tpu.memory_space<vmem>>, %arg1: memref<16x32xf32, #tpu.memory_space<vmem>>, %arg2: memref<1x16xf32, #tpu.memory_space<vmem>>, %arg3: memref<2x32xf32, #tpu.memory_space<vmem>>, %arg4: memref<2x8x1xf32, #tpu.memory_space<vmem>>) attributes {dimension_semantics = [], scalar_prefetch = 0 : i64, scratch_operands = 0 : i64, tpu.core_type = #tpu.core_type<tc>} {
    %c0 = arith.constant 0 : index
    %c0_0 = arith.constant 0 : index
    %c0_1 = arith.constant 0 : index
    %0 = vector.load %arg0[%c0, %c0_0, %c0_1] : memref<2x8x32xf32, #tpu.memory_space<vmem>>, vector<2x8x32xf32>
    %1 = vector.shape_cast %0 : vector<2x8x32xf32> to vector<16x32xf32>
    %c0_2 = arith.constant 0 : index
    %c0_3 = arith.constant 0 : index
    %2 = vector.load %arg1[%c0_2, %c0_3] : memref<16x32xf32, #tpu.memory_space<vmem>>, vector<16x32xf32>
    %cst = arith.constant dense<0.000000e+00> : vector<16x16xf32>
    %3 = tpu.matmul %1, %2, %cst {dimension_numbers = #tpu.dot_dimension_numbers<[1], [1], [0], [0], [0, 0, 1, 0], [], []>} : vector<16x32xf32>, vector<16x32xf32>, vector<16x16xf32> -> vector<16x16xf32>
    %4 = math.tanh %3 : vector<16x16xf32>
    %5 = vector.shape_cast %4 : vector<16x16xf32> to vector<2x8x16xf32>
    %c0_4 = arith.constant 0 : index
    %c0_5 = arith.constant 0 : index
    %6 = vector.load %arg2[%c0_4, %c0_5] : memref<1x16xf32, #tpu.memory_space<vmem>>, vector<1x16xf32>
    %7 = vector.shape_cast %6 : vector<1x16xf32> to vector<1x1x16xf32>
    %8 = vector.broadcast %7 : vector<1x1x16xf32> to vector<2x8x16xf32>
    %9 = arith.mulf %5, %8 : vector<2x8x16xf32>
    %cst_6 = arith.constant dense<0.000000e+00> : vector<2x8xf32>
    %10 = vector.multi_reduction <add>, %9, %cst_6 [2] : vector<2x8x16xf32> to vector<2x8xf32>
    %11 = vector.shape_cast %10 : vector<2x8xf32> to vector<2x8x1xf32>
    %c0_7 = arith.constant 0 : index
    %c0_8 = arith.constant 0 : index
    %c0_9 = arith.constant 0 : index
    %12 = vector.load %arg4[%c0_7, %c0_8, %c0_9] : memref<2x8x1xf32, #tpu.memory_space<vmem>>, vector<2x8x1xf32>
    tpu.vector_store %arg4[%c0_7, %c0_8, %c0_9], %11 {strides = array<i32>} : memref<2x8x1xf32, #tpu.memory_space<vmem>>, vector<2x8x1xf32>,
    %cst_10 = arith.constant dense<0xFF800000> : vector<2x1xf32>
    %13 = vector.multi_reduction <maximumf>, %11, %cst_10 [1] : vector<2x8x1xf32> to vector<2x1xf32>
    %14 = vector.shape_cast %13 : vector<2x1xf32> to vector<2x1x1xf32>
    %15 = vector.broadcast %14 : vector<2x1x1xf32> to vector<2x8x1xf32>
    %16 = arith.subf %11, %15 : vector<2x8x1xf32>
    %17 = math.exp %16 : vector<2x8x1xf32>
    %cst_11 = arith.constant dense<0.000000e+00> : vector<2x1xf32>
    %18 = vector.multi_reduction <add>, %17, %cst_11 [1] : vector<2x8x1xf32> to vector<2x1xf32>
    %19 = vector.shape_cast %18 : vector<2x1xf32> to vector<2x1x1xf32>
    %20 = tpu.reciprocal %19 {approx = true} : vector<2x1x1xf32> -> vector<2x1x1xf32>
    %21 = vector.broadcast %20 : vector<2x1x1xf32> to vector<2x8x1xf32>
    %22 = arith.mulf %17, %21 : vector<2x8x1xf32>
    %23 = vector.broadcast %22 : vector<2x8x1xf32> to vector<2x8x32xf32>
    %24 = arith.mulf %0, %23 : vector<2x8x32xf32>
    %cst_12 = arith.constant dense<0.000000e+00> : vector<2x32xf32>
    %25 = vector.multi_reduction <add>, %24, %cst_12 [1] : vector<2x8x32xf32> to vector<2x32xf32>
    %c0_13 = arith.constant 0 : index
    %c0_14 = arith.constant 0 : index
    %26 = vector.load %arg3[%c0_13, %c0_14] : memref<2x32xf32, #tpu.memory_space<vmem>>, vector<2x32xf32>
    tpu.vector_store %arg3[%c0_13, %c0_14], %25 {strides = array<i32>} : memref<2x32xf32, #tpu.memory_space<vmem>>, vector<2x32xf32>,
    return
  }
}

</mosaic_0001>

<bundles_post_ra>
// kernel: tpu_custom_call.1
= control target key start
LH: loop header
LB: loop body
LE: loop exit
PB: predicated region body
PF: predicated region fallthrough
CT: control target
= control target key end

     0   :  { %10 = vsyncpa [#allocation3], 0  ;;  %s394_s0 = inlined_call_operand.hbm [shape: f32[2,8,32], index: 0, kind: input, shape index: {}]   ;;  %s395_s1 = inlined_call_operand.hbm [shape: f32[16,32], index: 1, kind: input, shape index: {}]   ;;  %s396_s2 = inlined_call_operand.vmem [shape: f32[1,16], index: 2, kind: input, shape index: {}]   ;;  %s397_s3 = inlined_call_operand.hbm [shape: f32[2,32], index: 3, kind: output, shape index: {0}]   ;;  %s398_s4 = inlined_call_operand.vmem [shape: f32[2,8,1], index: 4, kind: output, shape index: {1}]  }
   0x1   :  { %11 = vsyncpa [#allocation6], 0 }
   0x2   :  { %12 = vsyncpa [#allocation4], 0  ;;  %s334_s15 = smov [#allocation2]  }
   0x3   :  { %s18_s16 = sshll.u32 %s334_s15, 4  ;;  %s19_s16 = int_to_ptr.vmem [resolvable:$true] %s18_s16 }
   0x4   :  { %s276_s17 = scalar_lea.vmem %s19_s16, 256  ;;  %p281_p1 = scmp.lt.s32.totalorder %s19_s16, %s19_s16 }
   0x5   :  { %p277_p0 = scmp.ne.s32.totalorder %s19_s16, %s276_s17  ;;  %p282_p2 = scmp.lt.s32.totalorder %s276_s17, %s276_s17 }
   0x7   :  { %p283_p3 = por %p282_p2, %p281_p1 }
   0x9   :  { %p284_p4 = pnand %p283_p3, %p277_p0 }
   0xb   :  { %287 = shalt.err (!%p284_p4)
}
   0xc   :  { %s335_s18 = smov 128   ;;  %s336_s19 = smov 8  }
   0xd   :  { %24 = dma.hbm_to_vmem [thread:$0]  %s394_s0, 256, %s19_s16, [#allocation3], %s335_s18, %s335_s18, %s336_s19  }
   0xe   :  { %s337_s22 = smov [#allocation5]  }
   0xf   :  { %s30_s23 = sshll.u32 %s337_s22, 4  ;;  %s31_s23 = int_to_ptr.vmem [resolvable:$true] %s30_s23 }
  0x10   :  { %s296_s24 = scalar_lea.vmem %s31_s23, 256  ;;  %p301_p6 = scmp.lt.s32.totalorder %s31_s23, %s31_s23 }
  0x11   :  { %p297_p5 = scmp.ne.s32.totalorder %s31_s23, %s296_s24  ;;  %p302_p7 = scmp.lt.s32.totalorder %s296_s24, %s296_s24 }
  0x13   :  { %p303_p8 = por %p302_p7, %p301_p6 }
  0x15   :  { %p304_p9 = pnand %p303_p8, %p297_p5 }
  0x17   :  { %307 = shalt.err (!%p304_p9)
}
  0x18   :  { %36 = dma.hbm_to_vmem [thread:$0]  %s395_s1, 256, %s31_s23, [#allocation6], %s335_s18, %s335_s18, %s336_s19  }
  0x19   :  { %328 = dma.done.wait [#allocation3], 256  }
  0x1a   :  { %329 = vsyncadd [#allocation3], 4294967040 }
  0x1b   :  { %330 = dma.done.wait [#allocation6], 256  }
  0x1c   :  { %331 = vsyncadd [#allocation6], 4294967040  ;;  %vm49_vm0 = vcmask 261120   ;;  %v48_v0 = vld [vmem:[#allocation5 + $0x8] sm:$0xff]  ;;  %v47_v1 = vld [vmem:[#allocation5] sm:$0xff]  ;;  %vm148_vm1 = vcmask 130048  }
  0x1d   :  { %v370_v2 = vld [vmem:[#allocation2] sm:$0xff]  ;;  %244 = vmatprep.subr.msk.mxu0 %vm49_vm0, %v48_v0  ;;  %v46_v3 = vld [vmem:[#allocation2 + $0x8] sm:$0xff]  ;;  %vm155_vm2 = vcmask 7168   ;;  %vm210_vm3 = vcmask 1041409   ;;  %vm213_vm4 = vcmask 254976  }
  0x1e   :  { %248 = vmatprep.mubr.msk.f32.mxu0 %vm49_vm0, %v370_v2  ;;  %245 = vmatpush3.xpose.msk.msra.mxu0 %vm49_vm0, %v48_v0  ;;  %v239_v8 = vld [vmem:[%s396_s2] ss:$0 sm:$0xff]  ;;  %s338_s2 = smov [#allocation7]  }
  0x1f   :  { %246 = vmatprep.subr.msk.mxu0 %vm49_vm0, %v47_v1 }
  0x22   :  { %247 = vmatpush3.xpose.msk.msra.mxu0 %vm49_vm0, %v47_v1 }
  0x25   :  { %249 = vmatmul.mubr.msk.f32.vlgmr.msra.gmra.mxu0 %vm49_vm0, %v46_v3 }
  0xe5   :  { %v250_v4 = vpop.f32.mrf.mxu0 }
  0xe6   :  { %256 = vtanh.f32 %v250_v4 }
  0xe7   :  { %v128_v5 = vpop.f32.mrf.mxu0 }
  0xe8   :  { %258 = vtanh.f32 %v128_v5 }
  0xf3   :  { %v257_v6 = vpop.eup %256 }
  0xf4   :  { %v147_v11 = vmul.f32 %v257_v6, %v239_v8 }
  0xf5   :  { %v259_v7 = vpop.eup %258 }
  0xf6   :  { %v146_v9 = vmul.f32 %v259_v7, %v239_v8  ;;  %v152_v12 = vsel %vm148_vm1, %v147_v11, 0.0 }
  0xf8   :  { %v149_v10 = vsel %vm148_vm1, %v146_v9, 0.0 }
  0xf9   :  { %150 = vadd.xlane.f32.xlu0 %v149_v10 }
  0xfd   :  { %153 = vadd.xlane.f32.xlu0 %v152_v12 }
 0x182   :  { %v151_v13 = vpop.xlane.xlu0 %150 }
 0x183   :  { %156 = vst.msk [vmem:[%s398_s4] sm:$0xff] %vm155_vm2, %v151_v13  ;;  %v158_v14 = vrot.slane %v151_v13, 4 }
 0x185   :  { %v159_v15 = vmax.f32 %v151_v13, %v158_v14 }
 0x186   :  { %v154_v16 = vpop.xlane.xlu0 %153 }
 0x187   :  { %v160_v17 = vrot.slane %v159_v15, 2  ;;  %157 = vst.msk [vmem:[%s398_s4 + $0x8] sm:$0xff] %vm155_vm2, %v154_v16  ;;  %v164_v18 = vrot.slane %v154_v16, 4  ;;  %s221_s4 = sshll.u32 %s338_s2, 4  ;;  %s222_s4 = int_to_ptr.vmem [resolvable:$true] %s221_s4 }
 0x188   :  { %s308_s5 = scalar_lea.vmem %s222_s4, 32  ;;  %p313_p11 = scmp.lt.s32.totalorder %s222_s4, %s222_s4 }
 0x189   :  { %v161_v19 = vmax.f32 %v159_v15, %v160_v17  ;;  %v165_v20 = vmax.f32 %v154_v16, %v164_v18  ;;  %p309_p10 = scmp.ne.s32.totalorder %s222_s4, %s308_s5  ;;  %p314_p12 = scmp.lt.s32.totalorder %s308_s5, %s308_s5 }
 0x18b   :  { %v162_v21 = vrot.slane %v161_v19, 1  ;;  %v166_v22 = vrot.slane %v165_v20, 2  ;;  %p315_p13 = por %p314_p12, %p313_p11 }
 0x18d   :  { %v163_v23 = vmax.f32 %v161_v19, %v162_v21  ;;  %v167_v24 = vmax.f32 %v165_v20, %v166_v22  ;;  %p316_p0 = pnand %p315_p13, %p309_p10 }
 0x18f   :  { %v170_v25 = vsub.f32 %v151_v13, %v163_v23  ;;  %v168_v26 = vrot.slane %v167_v24, 1 }
 0x191   :  { %v172_v27 = vmul.f32 1.442695, %v170_v25  ;;  %v169_v28 = vmax.f32 %v167_v24, %v168_v26 }
 0x193   :  { %260 = vpow2.f32 %v172_v27  ;;  %v171_v29 = vsub.f32 %v154_v16, %v169_v28 }
 0x195   :  { %v174_v30 = vmul.f32 1.442695, %v171_v29 }
 0x197   :  { %262 = vpow2.f32 %v174_v30 }
 0x1a0   :  { %v261_v31 = vpop.eup %260 }
 0x1a1   :  { %v176_v32 = vrot.slane %v261_v31, 4 }
 0x1a3   :  { %v177_v33 = vadd.f32 %v261_v31, %v176_v32 }
 0x1a4   :  { %v263_v34 = vpop.eup %262 }
 0x1a5   :  { %v182_v35 = vrot.slane %v263_v34, 4  ;;  %v178_v36 = vrot.slane %v177_v33, 2 }
 0x1a7   :  { %v179_v37 = vadd.f32 %v178_v36, %v177_v33  ;;  %v183_v38 = vadd.f32 %v263_v34, %v182_v35 }
 0x1a9   :  { %v180_v39 = vrot.slane %v179_v37, 1  ;;  %v184_v40 = vrot.slane %v183_v38, 2 }
 0x1ab   :  { %v181_v41 = vadd.f32 %v180_v39, %v179_v37  ;;  %v185_v42 = vadd.f32 %v184_v40, %v183_v38 }
 0x1ad   :  { %v186_v43 = vrot.slane %v185_v42, 1  ;;  %264 = vrcp.f32 %v181_v41 }
 0x1af   :  { %v187_v44 = vadd.f32 %v186_v43, %v185_v42 }
 0x1b1   :  { %266 = vrcp.f32 %v187_v44 }
 0x1ba   :  { %v265_v45 = vpop.eup %264 }
 0x1bb   :  { %v190_v46 = vmul.f32 %v265_v45, %v261_v31 }
 0x1bd   :  { %v192_v47 = vmul.f32 %v190_v46, %v370_v2 }
 0x1be   :  { %v267_v48 = vpop.eup %266 }
 0x1bf   :  { %v191_v49 = vmul.f32 %v267_v48, %v263_v34  ;;  %v194_v50 = vsel %vm49_vm0, %v192_v47, 0.0 }
 0x1c0   :  { %v195_v51 = vrot.slane %v194_v50, 4 }
 0x1c1   :  { %v193_v52 = vmul.f32 %v191_v49, %v46_v3 }
 0x1c2   :  { %v196_v53 = vadd.f32 %v195_v51, %v194_v50 }
 0x1c3   :  { %v201_v54 = vsel %vm49_vm0, %v193_v52, 0.0 }
 0x1c4   :  { %v197_v55 = vrot.slane %v196_v53, 2  ;;  %v202_v56 = vrot.slane %v201_v54, 4 }
 0x1c6   :  { %v198_v57 = vadd.f32 %v197_v55, %v196_v53  ;;  %v203_v58 = vadd.f32 %v202_v56, %v201_v54 }
 0x1c8   :  { %v204_v59 = vrot.slane %v203_v58, 2  ;;  %v199_v60 = vrot.slane %v198_v57, 1 }
 0x1ca   :  { %v205_v61 = vadd.f32 %v204_v59, %v203_v58  ;;  %v200_v63 = vadd.f32 %v199_v60, %v198_v57 }
 0x1cc   :  { %v206_v62 = vrot.slane %v205_v61, 1 }
 0x1ce   :  { %v207_v0 = vadd.f32 %v206_v62, %v205_v61 }
 0x1d0   :  { %v211_v1 = vsel %vm210_vm3, %v207_v0, %v200_v63 }
 0x1d1   :  { %214 = vst.msk [vmem:[#allocation7] sm:$0x3] %vm213_vm4, %v211_v1 }
 0x1d2   :  { %319 = shalt.err (!%p316_p0)
}
 0x1d3   :  { %224 = dma.vmem_to_hbm [thread:$0]  %s222_s4, 32, %s397_s3, [#allocation4]  }
 0x1d4   :  { %332 = dma.done.wait [#allocation4], 32  }
 0x1d5   :  { %333 = vsyncadd [#allocation4], 4294967264 }
 0x1d6   :  { %232 = vsyncpa [#allocation3], 1 }
 0x1d7   :  { %233 = vsyncpa [#allocation6], 1 }
 0x1d8   :  { %234 = vsyncpa [#allocation4], 1 }

</bundles_post_ra>
